<compile_context>
chip_gen: v7x
topology: tpu7x:2x2x1
jax: 0.10.0
libtpu: 0.0.40
codegen_flags: <defaults>
</compile_context>

<pallas_src>
import functools

import jax
import jax.numpy as jnp
from jax import lax
from jax.experimental import pallas as pl
from jax.experimental.pallas import tpu as pltpu

# Module hyperparameters (defaults of TverskyLossWSigmoid)
ALPHA = 0.7          # multiplies FP
BETA = 0.3           # multiplies FN
SMOOTH = 1.0
W_TVERSKY = 0.7
W_BCE = 0.3

LANES = 128
ACC_ROWS = 8         # accumulators are exactly one (8, 128) vreg each
TILE_ROWS = 4096     # (4096, 128) f32 block = 2 MiB; x+t double-buffered ~ 8 MiB VMEM
CHUNK_ROWS = 64      # 64 rows = 8 vregs per temporary; keeps elementwise temps in vregs
N_SPLITS = 2         # leading "parallel" grid axis (both TCs on v7x; harmless on 1-TC)
PAD_X = -1e4         # pad logit: sigmoid -> 0, bce -> 0 (with t = 0) => zero contribution


def _round_up(v, m):
    return ((v + m - 1) // m) * m


def _partial_sums(x, t, chunk_rows):
    """Elementwise math for one (chunk_rows, 128) chunk, folded to (8, 128) partials.

    p   = sigmoid(x) = 0.5 + 0.5*tanh(x/2)            (exact, no divide)
    bce = max(x,0) - x*t + log1p(exp(-|x|))
        = max(x,0) - x*t - log(max(p, 1-p))            (reuses p; 2 EUP ops/elem total)
    """
    p = 0.5 + 0.5 * jnp.tanh(0.5 * x)
    q = jnp.maximum(p, 1.0 - p)                        # = sigmoid(|x|), no cancellation
    bce = jnp.maximum(x, 0.0) - x * t - jnp.log(q)

    def fold(v):
        # (chunk_rows, 128) -> (8, 128): pure vreg regrouping + VPU adds (no XLU).
        return v.reshape(chunk_rows // ACC_ROWS, ACC_ROWS, LANES).sum(axis=0)

    return fold(p), fold(t), fold(p * t), fold(bce)


def _loss_kernel(x_ref, t_ref, acc_ref, *, valid_rows, tile_rows, chunk_rows):
    i = pl.program_id(0)
    j = pl.program_id(1)
    steps = pl.num_programs(1)

    @pl.when(j == 0)
    def _():
        acc_ref[...] = jnp.zeros(acc_ref.shape, acc_ref.dtype)

    bi = i * steps + j                 # global row-block index
    row0 = bi * tile_rows              # first global row of this block
    n_chunks = tile_rows // chunk_rows
    unroll = 2 if n_chunks % 2 == 0 else 1
    zeros = (jnp.zeros((ACC_ROWS, LANES), jnp.float32),) * 4

    def load(c):
        r = pl.multiple_of(c * chunk_rows, chunk_rows)
        return r, x_ref[pl.ds(r, chunk_rows), :], t_ref[pl.ds(r, chunk_rows), :]

    def add(carry, deltas):
        return tuple(a + d for a, d in zip(carry, deltas))

    def body_full(c, carry):
        _, x, t = load(c)
        return add(carry, _partial_sums(x, t, chunk_rows))

    def body_masked(c, carry):
        # Only the ragged last block (and any clamped "ghost" block) runs this path.
        r, x, t = load(c)
        row = lax.broadcasted_iota(jnp.int32, (chunk_rows, LANES), 0)
        valid = (row0 + r + row) < valid_rows
        x = jnp.where(valid, x, PAD_X)   # replace out-of-range garbage before any math
        t = jnp.where(valid, t, 0.0)
        return add(carry, _partial_sums(x, t, chunk_rows))

    def accumulate(body):
        sp, st, spt, sbce = lax.fori_loop(0, n_chunks, body, zeros, unroll=unroll)
        acc_ref[0] += sp       # sum(p)
        acc_ref[1] += st       # sum(t)
        acc_ref[2] += spt      # TP = sum(p*t)
        acc_ref[3] += sbce     # sum of elementwise BCE

    is_full = row0 + tile_rows <= valid_rows

    @pl.when(is_full)
    def _():
        accumulate(body_full)

    @pl.when(jnp.logical_not(is_full))
    def _():
        accumulate(body_masked)


def tversky_loss_w_sigmoid(inputs, targets):
    """inputs: NCHW float logits; targets: NCHW {0,1} (or soft labels), any float/bool dtype."""
    x = inputs.reshape(-1).astype(jnp.float32)
    t = targets.reshape(-1).astype(jnp.float32)   # native float targets (no int8 round-trip)
    n = x.shape[0]

    # Lane alignment: only if n is not a multiple of 128 do we pad the sub-128 remainder
    # (zero-contribution PAD_X / 0 values).  Typical image tensors skip this copy entirely.
    rem = (-n) % LANES
    n_rows = (n + rem) // LANES

    if n_rows >= TILE_ROWS:
        # Hot path: no padding of the big arrays; the ragged last block is masked in-kernel.
        tile_rows, chunk_rows, pad_rows = TILE_ROWS, CHUNK_ROWS, 0
    else:
        # Small input: round rows up to a chunk multiple (tiny copy) so one tile covers it.
        chunk_rows = min(CHUNK_ROWS, _round_up(max(n_rows, 1), ACC_ROWS))
        tile_rows = _round_up(n_rows, chunk_rows)
        pad_rows = tile_rows - n_rows

    pad_elems = rem + pad_rows * LANES
    if pad_elems:
        x = jnp.pad(x, (0, pad_elems), constant_values=PAD_X)
        t = jnp.pad(t, (0, pad_elems))
    rows_padded = n_rows + pad_rows

    x2 = x.reshape(rows_padded, LANES)
    t2 = t.reshape(rows_padded, LANES)

    total_blocks = pl.cdiv(rows_padded, tile_rows)
    n_splits = min(N_SPLITS, total_blocks)
    steps = pl.cdiv(total_blocks, n_splits)
    last_block = total_blocks - 1

    # Ghost blocks (when total_blocks is not a multiple of n_splits) re-read the last real
    # block (clamped index) and are fully masked in-kernel, so they contribute zero.
    in_spec = pl.BlockSpec(
        (tile_rows, LANES),
        lambda i, j: (jnp.minimum(i * steps + j, last_block), 0))
    out_spec = pl.BlockSpec((None, 4, ACC_ROWS, LANES), lambda i, j: (i, 0, 0, 0))

    kernel = functools.partial(
        _loss_kernel,
        valid_rows=rows_padded, tile_rows=tile_rows, chunk_rows=chunk_rows)

    acc = pl.pallas_call(
        kernel,
        out_shape=jax.ShapeDtypeStruct((n_splits, 4, ACC_ROWS, LANES), jnp.float32),
        grid_spec=pltpu.PrefetchScalarGridSpec(
            num_scalar_prefetch=0,
            grid=(n_splits, steps),
            in_specs=[in_spec, in_spec],
            out_specs=out_spec,
        ),
        compiler_params=pltpu.CompilerParams(
            # NOTE: on v7x, switch the leading axis to pltpu.CORE_PARALLEL if a profile
            # shows one TensorCore idle; "parallel" is kept here for portability.
            dimension_semantics=("parallel", "arbitrary")),
        cost_estimate=pl.CostEstimate(
            flops=11 * rows_padded * LANES,
            transcendentals=2 * rows_padded * LANES,
            bytes_accessed=8 * rows_padded * LANES + n_splits * 4 * ACC_ROWS * LANES * 4),
    )(x2, t2)

    # Tiny finalize (a handful of scalars) in plain JAX.
    sums = jnp.sum(acc, axis=(0, 2, 3))               # (4,)
    sum_p, sum_t, tp, sum_bce = sums[0], sums[1], sums[2], sums[3]
    fp = sum_p - tp                                    # FP = sum(p) - TP
    fn = sum_t - tp                                    # FN = sum(t) - TP
    bce_mean = sum_bce / n
    tversky_loss = 1.0 - (tp + SMOOTH) / (tp + ALPHA * fp + BETA * fn + SMOOTH)
    return W_TVERSKY * tversky_loss + W_BCE * bce_mean


def _reference(inputs, targets):
    x = inputs.reshape(-1).astype(jnp.float32)
    t = targets.reshape(-1).astype(jnp.float32)
    p = jax.nn.sigmoid(x)
    tp = jnp.sum(p * t)
    fp = jnp.sum((1.0 - t) * p)
    fn = jnp.sum(t * (1.0 - p))
    tversky_loss = 1.0 - (tp + SMOOTH) / (tp + ALPHA * fp + BETA * fn + SMOOTH)
    bce = jnp.mean(jnp.maximum(x, 0.0) - x * t + jnp.log1p(jnp.exp(-jnp.abs(x))))
    return W_TVERSKY * tversky_loss + W_BCE * bce


if __name__ == "__main__":
    key = jax.random.PRNGKey(0)
    k_x, k_t = jax.random.split(key)
    # NCHW: batch=2, channels=4, spatial=16x16
    inputs = jax.random.normal(k_x, (2, 4, 16, 16), dtype=jnp.float32)
    targets = (jax.random.uniform(k_t, (2, 4, 16, 16)) > 0.5).astype(jnp.float32)

    loss = tversky_loss_w_sigmoid(inputs, targets)
    loss = jax.block_until_ready(loss)

    ref = _reference(inputs, targets)
    assert jnp.allclose(loss, ref, rtol=1e-5, atol=1e-6), (loss, ref)
    print("KERNEL_OK")
</pallas_src>

<mosaic_0001>
module attributes {stable_mosaic.version = 11 : i64} {
  func.func @_loss_kernel(%arg0: i32, %arg1: i32, %arg2: memref<16x128xf32, #tpu.memory_space<vmem>>, %arg3: memref<16x128xf32, #tpu.memory_space<vmem>>, %arg4: memref<1x4x8x128xf32, #tpu.memory_space<vmem>>) attributes {dimension_semantics = [#tpu.dimension_semantics<parallel>, #tpu.dimension_semantics<arbitrary>], iteration_bounds = array<i64: 1, 1>, scalar_prefetch = 0 : i64, scratch_operands = 0 : i64, tpu.core_type = #tpu.core_type<tc>, window_params = [{transform_indices = @transform_0, window_bounds = array<i64: 16, 128>}, {transform_indices = @transform_1, window_bounds = array<i64: 16, 128>}, {transform_indices = @transform_2, window_bounds = array<i64: 1, 4, 8, 128>}]} {
    %c0_i32 = arith.constant 0 : i32
    %0 = arith.cmpi eq, %arg1, %c0_i32 : i32
    %1 = arith.extui %0 : i1 to i32
    %c0_i32_0 = arith.constant 0 : i32
    %2 = arith.cmpi ne, %1, %c0_i32_0 : i32
    scf.if %2 {
      %cst_5 = arith.constant 0.000000e+00 : f32
      %14 = vector.broadcast %cst_5 : f32 to vector<4x8x128xf32>
      %c0 = arith.constant 0 : index
      %c0_6 = arith.constant 0 : index
      %c0_7 = arith.constant 0 : index
      %c0_8 = arith.constant 0 : index
      %15 = vector.load %arg4[%c0, %c0_6, %c0_7, %c0_8] : memref<1x4x8x128xf32, #tpu.memory_space<vmem>>, vector<1x4x8x128xf32>
      %16 = vector.shape_cast %15 : vector<1x4x8x128xf32> to vector<4x8x128xf32>
      %17 = vector.shape_cast %14 : vector<4x8x128xf32> to vector<1x4x8x128xf32>
      tpu.vector_store %arg4[%c0, %c0_6, %c0_7, %c0_8], %17 {strides = array<i32>} : memref<1x4x8x128xf32, #tpu.memory_space<vmem>>, vector<1x4x8x128xf32>,
    } else {
    }
    %c1_i32 = arith.constant 1 : i32
    %3 = arith.muli %arg0, %c1_i32 : i32
    %4 = arith.addi %3, %arg1 : i32
    %c16_i32 = arith.constant 16 : i32
    %5 = arith.muli %4, %c16_i32 : i32
    %cst = arith.constant 0.000000e+00 : f32
    %6 = vector.broadcast %cst : f32 to vector<8x128xf32>
    %c16_i32_1 = arith.constant 16 : i32
    %7 = arith.addi %5, %c16_i32_1 : i32
    %c16_i32_2 = arith.constant 16 : i32
    %8 = arith.cmpi sle, %7, %c16_i32_2 : i32
    %9 = arith.extui %8 : i1 to i32
    %c0_i32_3 = arith.constant 0 : i32
    %10 = arith.cmpi ne, %9, %c0_i32_3 : i32
    scf.if %10 {
      %c0_i32_5 = arith.constant 0 : i32
      %c16_i32_6 = arith.constant 16 : i32
      %14 = arith.muli %c0_i32_5, %c16_i32_6 : i32
      %15 = tpu.assume_multiple %14, 16 : i32
      %16 = arith.index_cast %15 : i32 to index
      %c0 = arith.constant 0 : index
      %17 = vector.load %arg2[%16, %c0] : memref<16x128xf32, #tpu.memory_space<vmem>>, vector<16x128xf32>
      %18 = arith.index_cast %15 : i32 to index
      %c0_7 = arith.constant 0 : index
      %19 = vector.load %arg3[%18, %c0_7] : memref<16x128xf32, #tpu.memory_space<vmem>>, vector<16x128xf32>
      %cst_8 = arith.constant 5.000000e-01 : f32
      %20 = vector.broadcast %cst_8 : f32 to vector<16x128xf32>
      %21 = arith.mulf %20, %17 : vector<16x128xf32>
      %22 = math.tanh %21 : vector<16x128xf32>
      %cst_9 = arith.constant 5.000000e-01 : f32
      %23 = vector.broadcast %cst_9 : f32 to vector<16x128xf32>
      %24 = arith.mulf %23, %22 : vector<16x128xf32>
      %cst_10 = arith.constant 5.000000e-01 : f32
      %25 = vector.broadcast %cst_10 : f32 to vector<16x128xf32>
      %26 = arith.addf %25, %24 : vector<16x128xf32>
      %cst_11 = arith.constant 1.000000e+00 : f32
      %27 = vector.broadcast %cst_11 : f32 to vector<16x128xf32>
      %28 = arith.subf %27, %26 : vector<16x128xf32>
      %29 = arith.maximumf %26, %28 : vector<16x128xf32>
      %cst_12 = arith.constant 0.000000e+00 : f32
      %30 = vector.broadcast %cst_12 : f32 to vector<16x128xf32>
      %31 = arith.maximumf %17, %30 : vector<16x128xf32>
      %32 = arith.mulf %17, %19 : vector<16x128xf32>
      %33 = arith.subf %31, %32 : vector<16x128xf32>
      %34 = math.log %29 : vector<16x128xf32>
      %35 = arith.subf %33, %34 : vector<16x128xf32>
      %36 = vector.shape_cast %26 : vector<16x128xf32> to vector<2x8x128xf32>
      %cst_13 = arith.constant dense<0.000000e+00> : vector<8x128xf32>
      %37 = vector.multi_reduction <add>, %36, %cst_13 [0] : vector<2x8x128xf32> to vector<8x128xf32>
      %38 = vector.shape_cast %19 : vector<16x128xf32> to vector<2x8x128xf32>
      %cst_14 = arith.constant dense<0.000000e+00> : vector<8x128xf32>
      %39 = vector.multi_reduction <add>, %38, %cst_14 [0] : vector<2x8x128xf32> to vector<8x128xf32>
      %40 = arith.mulf %26, %19 : vector<16x128xf32>
      %41 = vector.shape_cast %40 : vector<16x128xf32> to vector<2x8x128xf32>
      %cst_15 = arith.constant dense<0.000000e+00> : vector<8x128xf32>
      %42 = vector.multi_reduction <add>, %41, %cst_15 [0] : vector<2x8x128xf32> to vector<8x128xf32>
      %43 = vector.shape_cast %35 : vector<16x128xf32> to vector<2x8x128xf32>
      %cst_16 = arith.constant dense<0.000000e+00> : vector<8x128xf32>
      %44 = vector.multi_reduction <add>, %43, %cst_16 [0] : vector<2x8x128xf32> to vector<8x128xf32>
      %45 = arith.addf %6, %37 : vector<8x128xf32>
      %46 = arith.addf %6, %39 : vector<8x128xf32>
      %47 = arith.addf %6, %42 : vector<8x128xf32>
      %48 = arith.addf %6, %44 : vector<8x128xf32>
      %c1_i32_17 = arith.constant 1 : i32
      %c0_18 = arith.constant 0 : index
      %c0_19 = arith.constant 0 : index
      %c0_20 = arith.constant 0 : index
      %c0_21 = arith.constant 0 : index
      %49 = vector.load %arg4[%c0_18, %c0_19, %c0_20, %c0_21] : memref<1x4x8x128xf32, #tpu.memory_space<vmem>>, vector<1x1x8x128xf32>
      %50 = vector.shape_cast %49 : vector<1x1x8x128xf32> to vector<8x128xf32>
      %51 = arith.addf %50, %45 : vector<8x128xf32>
      %c0_22 = arith.constant 0 : index
      %c0_23 = arith.constant 0 : index
      %c0_24 = arith.constant 0 : index
      %c0_25 = arith.constant 0 : index
      %52 = vector.load %arg4[%c0_22, %c0_23, %c0_24, %c0_25] : memref<1x4x8x128xf32, #tpu.memory_space<vmem>>, vector<1x1x8x128xf32>
      %53 = vector.shape_cast %52 : vector<1x1x8x128xf32> to vector<8x128xf32>
      %54 = vector.shape_cast %51 : vector<8x128xf32> to vector<1x1x8x128xf32>
      tpu.vector_store %arg4[%c0_22, %c0_23, %c0_24, %c0_25], %54 {strides = array<i32>} : memref<1x4x8x128xf32, #tpu.memory_space<vmem>>, vector<1x1x8x128xf32>,
      %c0_26 = arith.constant 0 : index
      %c1 = arith.constant 1 : index
      %c0_27 = arith.constant 0 : index
      %c0_28 = arith.constant 0 : index
      %55 = vector.load %arg4[%c0_26, %c1, %c0_27, %c0_28] : memref<1x4x8x128xf32, #tpu.memory_space<vmem>>, vector<1x1x8x128xf32>
      %56 = vector.shape_cast %55 : vector<1x1x8x128xf32> to vector<8x128xf32>
      %57 = arith.addf %56, %46 : vector<8x128xf32>
      %c0_29 = arith.constant 0 : index
      %c1_30 = arith.constant 1 : index
      %c0_31 = arith.constant 0 : index
      %c0_32 = arith.constant 0 : index
      %58 = vector.load %arg4[%c0_29, %c1_30, %c0_31, %c0_32] : memref<1x4x8x128xf32, #tpu.memory_space<vmem>>, vector<1x1x8x128xf32>
      %59 = vector.shape_cast %58 : vector<1x1x8x128xf32> to vector<8x128xf32>
      %60 = vector.shape_cast %57 : vector<8x128xf32> to vector<1x1x8x128xf32>
      tpu.vector_store %arg4[%c0_29, %c1_30, %c0_31, %c0_32], %60 {strides = array<i32>} : memref<1x4x8x128xf32, #tpu.memory_space<vmem>>, vector<1x1x8x128xf32>,
      %c0_33 = arith.constant 0 : index
      %c2 = arith.constant 2 : index
      %c0_34 = arith.constant 0 : index
      %c0_35 = arith.constant 0 : index
      %61 = vector.load %arg4[%c0_33, %c2, %c0_34, %c0_35] : memref<1x4x8x128xf32, #tpu.memory_space<vmem>>, vector<1x1x8x128xf32>
      %62 = vector.shape_cast %61 : vector<1x1x8x128xf32> to vector<8x128xf32>
      %63 = arith.addf %62, %47 : vector<8x128xf32>
      %c0_36 = arith.constant 0 : index
      %c2_37 = arith.constant 2 : index
      %c0_38 = arith.constant 0 : index
      %c0_39 = arith.constant 0 : index
      %64 = vector.load %arg4[%c0_36, %c2_37, %c0_38, %c0_39] : memref<1x4x8x128xf32, #tpu.memory_space<vmem>>, vector<1x1x8x128xf32>
      %65 = vector.shape_cast %64 : vector<1x1x8x128xf32> to vector<8x128xf32>
      %66 = vector.shape_cast %63 : vector<8x128xf32> to vector<1x1x8x128xf32>
      tpu.vector_store %arg4[%c0_36, %c2_37, %c0_38, %c0_39], %66 {strides = array<i32>} : memref<1x4x8x128xf32, #tpu.memory_space<vmem>>, vector<1x1x8x128xf32>,
      %c0_40 = arith.constant 0 : index
      %c3 = arith.constant 3 : index
      %c0_41 = arith.constant 0 : index
      %c0_42 = arith.constant 0 : index
      %67 = vector.load %arg4[%c0_40, %c3, %c0_41, %c0_42] : memref<1x4x8x128xf32, #tpu.memory_space<vmem>>, vector<1x1x8x128xf32>
      %68 = vector.shape_cast %67 : vector<1x1x8x128xf32> to vector<8x128xf32>
      %69 = arith.addf %68, %48 : vector<8x128xf32>
      %c0_43 = arith.constant 0 : index
      %c3_44 = arith.constant 3 : index
      %c0_45 = arith.constant 0 : index
      %c0_46 = arith.constant 0 : index
      %70 = vector.load %arg4[%c0_43, %c3_44, %c0_45, %c0_46] : memref<1x4x8x128xf32, #tpu.memory_space<vmem>>, vector<1x1x8x128xf32>
      %71 = vector.shape_cast %70 : vector<1x1x8x128xf32> to vector<8x128xf32>
      %72 = vector.shape_cast %69 : vector<8x128xf32> to vector<1x1x8x128xf32>
      tpu.vector_store %arg4[%c0_43, %c3_44, %c0_45, %c0_46], %72 {strides = array<i32>} : memref<1x4x8x128xf32, #tpu.memory_space<vmem>>, vector<1x1x8x128xf32>,
    } else {
    }
    %true = arith.constant true
    %11 = arith.xori %8, %true : i1
    %12 = arith.extui %11 : i1 to i32
    %c0_i32_4 = arith.constant 0 : i32
    %13 = arith.cmpi ne, %12, %c0_i32_4 : i32
    scf.if %13 {
      %c0_i32_5 = arith.constant 0 : i32
      %c16_i32_6 = arith.constant 16 : i32
      %14 = arith.muli %c0_i32_5, %c16_i32_6 : i32
      %15 = tpu.assume_multiple %14, 16 : i32
      %16 = arith.index_cast %15 : i32 to index
      %c0 = arith.constant 0 : index
      %17 = vector.load %arg2[%16, %c0] : memref<16x128xf32, #tpu.memory_space<vmem>>, vector<16x128xf32>
      %18 = arith.index_cast %15 : i32 to index
      %c0_7 = arith.constant 0 : index
      %19 = vector.load %arg3[%18, %c0_7] : memref<16x128xf32, #tpu.memory_space<vmem>>, vector<16x128xf32>
      %20 = tpu.iota {dimensions = array<i32: 0>} : vector<16x128xi32>
      %21 = arith.addi %5, %15 : i32
      %22 = vector.broadcast %21 : i32 to vector<16x128xi32>
      %23 = arith.addi %22, %20 : vector<16x128xi32>
      %c16_i32_8 = arith.constant 16 : i32
      %24 = vector.broadcast %c16_i32_8 : i32 to vector<16x128xi32>
      %25 = arith.cmpi slt, %23, %24 : vector<16x128xi32>
      %cst_9 = arith.constant -1.000000e+04 : f32
      %26 = vector.broadcast %cst_9 : f32 to vector<16x128xf32>
      %27 = arith.select %25, %17, %26 : vector<16x128xi1>, vector<16x128xf32>
      %cst_10 = arith.constant 0.000000e+00 : f32
      %28 = vector.broadcast %cst_10 : f32 to vector<16x128xf32>
      %29 = arith.select %25, %19, %28 : vector<16x128xi1>, vector<16x128xf32>
      %cst_11 = arith.constant 5.000000e-01 : f32
      %30 = vector.broadcast %cst_11 : f32 to vector<16x128xf32>
      %31 = arith.mulf %30, %27 : vector<16x128xf32>
      %32 = math.tanh %31 : vector<16x128xf32>
      %cst_12 = arith.constant 5.000000e-01 : f32
      %33 = vector.broadcast %cst_12 : f32 to vector<16x128xf32>
      %34 = arith.mulf %33, %32 : vector<16x128xf32>
      %cst_13 = arith.constant 5.000000e-01 : f32
      %35 = vector.broadcast %cst_13 : f32 to vector<16x128xf32>
      %36 = arith.addf %35, %34 : vector<16x128xf32>
      %cst_14 = arith.constant 1.000000e+00 : f32
      %37 = vector.broadcast %cst_14 : f32 to vector<16x128xf32>
      %38 = arith.subf %37, %36 : vector<16x128xf32>
      %39 = arith.maximumf %36, %38 : vector<16x128xf32>
      %cst_15 = arith.constant 0.000000e+00 : f32
      %40 = vector.broadcast %cst_15 : f32 to vector<16x128xf32>
      %41 = arith.maximumf %27, %40 : vector<16x128xf32>
      %42 = arith.mulf %27, %29 : vector<16x128xf32>
      %43 = arith.subf %41, %42 : vector<16x128xf32>
      %44 = math.log %39 : vector<16x128xf32>
      %45 = arith.subf %43, %44 : vector<16x128xf32>
      %46 = vector.shape_cast %36 : vector<16x128xf32> to vector<2x8x128xf32>
      %cst_16 = arith.constant dense<0.000000e+00> : vector<8x128xf32>
      %47 = vector.multi_reduction <add>, %46, %cst_16 [0] : vector<2x8x128xf32> to vector<8x128xf32>
      %48 = vector.shape_cast %29 : vector<16x128xf32> to vector<2x8x128xf32>
      %cst_17 = arith.constant dense<0.000000e+00> : vector<8x128xf32>
      %49 = vector.multi_reduction <add>, %48, %cst_17 [0] : vector<2x8x128xf32> to vector<8x128xf32>
      %50 = arith.mulf %36, %29 : vector<16x128xf32>
      %51 = vector.shape_cast %50 : vector<16x128xf32> to vector<2x8x128xf32>
      %cst_18 = arith.constant dense<0.000000e+00> : vector<8x128xf32>
      %52 = vector.multi_reduction <add>, %51, %cst_18 [0] : vector<2x8x128xf32> to vector<8x128xf32>
      %53 = vector.shape_cast %45 : vector<16x128xf32> to vector<2x8x128xf32>
      %cst_19 = arith.constant dense<0.000000e+00> : vector<8x128xf32>
      %54 = vector.multi_reduction <add>, %53, %cst_19 [0] : vector<2x8x128xf32> to vector<8x128xf32>
      %55 = arith.addf %6, %47 : vector<8x128xf32>
      %56 = arith.addf %6, %49 : vector<8x128xf32>
      %57 = arith.addf %6, %52 : vector<8x128xf32>
      %58 = arith.addf %6, %54 : vector<8x128xf32>
      %c1_i32_20 = arith.constant 1 : i32
      %c0_21 = arith.constant 0 : index
      %c0_22 = arith.constant 0 : index
      %c0_23 = arith.constant 0 : index
      %c0_24 = arith.constant 0 : index
      %59 = vector.load %arg4[%c0_21, %c0_22, %c0_23, %c0_24] : memref<1x4x8x128xf32, #tpu.memory_space<vmem>>, vector<1x1x8x128xf32>
      %60 = vector.shape_cast %59 : vector<1x1x8x128xf32> to vector<8x128xf32>
      %61 = arith.addf %60, %55 : vector<8x128xf32>
      %c0_25 = arith.constant 0 : index
      %c0_26 = arith.constant 0 : index
      %c0_27 = arith.constant 0 : index
      %c0_28 = arith.constant 0 : index
      %62 = vector.load %arg4[%c0_25, %c0_26, %c0_27, %c0_28] : memref<1x4x8x128xf32, #tpu.memory_space<vmem>>, vector<1x1x8x128xf32>
      %63 = vector.shape_cast %62 : vector<1x1x8x128xf32> to vector<8x128xf32>
      %64 = vector.shape_cast %61 : vector<8x128xf32> to vector<1x1x8x128xf32>
      tpu.vector_store %arg4[%c0_25, %c0_26, %c0_27, %c0_28], %64 {strides = array<i32>} : memref<1x4x8x128xf32, #tpu.memory_space<vmem>>, vector<1x1x8x128xf32>,
      %c0_29 = arith.constant 0 : index
      %c1 = arith.constant 1 : index
      %c0_30 = arith.constant 0 : index
      %c0_31 = arith.constant 0 : index
      %65 = vector.load %arg4[%c0_29, %c1, %c0_30, %c0_31] : memref<1x4x8x128xf32, #tpu.memory_space<vmem>>, vector<1x1x8x128xf32>
      %66 = vector.shape_cast %65 : vector<1x1x8x128xf32> to vector<8x128xf32>
      %67 = arith.addf %66, %56 : vector<8x128xf32>
      %c0_32 = arith.constant 0 : index
      %c1_33 = arith.constant 1 : index
      %c0_34 = arith.constant 0 : index
      %c0_35 = arith.constant 0 : index
      %68 = vector.load %arg4[%c0_32, %c1_33, %c0_34, %c0_35] : memref<1x4x8x128xf32, #tpu.memory_space<vmem>>, vector<1x1x8x128xf32>
      %69 = vector.shape_cast %68 : vector<1x1x8x128xf32> to vector<8x128xf32>
      %70 = vector.shape_cast %67 : vector<8x128xf32> to vector<1x1x8x128xf32>
      tpu.vector_store %arg4[%c0_32, %c1_33, %c0_34, %c0_35], %70 {strides = array<i32>} : memref<1x4x8x128xf32, #tpu.memory_space<vmem>>, vector<1x1x8x128xf32>,
      %c0_36 = arith.constant 0 : index
      %c2 = arith.constant 2 : index
      %c0_37 = arith.constant 0 : index
      %c0_38 = arith.constant 0 : index
      %71 = vector.load %arg4[%c0_36, %c2, %c0_37, %c0_38] : memref<1x4x8x128xf32, #tpu.memory_space<vmem>>, vector<1x1x8x128xf32>
      %72 = vector.shape_cast %71 : vector<1x1x8x128xf32> to vector<8x128xf32>
      %73 = arith.addf %72, %57 : vector<8x128xf32>
      %c0_39 = arith.constant 0 : index
      %c2_40 = arith.constant 2 : index
      %c0_41 = arith.constant 0 : index
      %c0_42 = arith.constant 0 : index
      %74 = vector.load %arg4[%c0_39, %c2_40, %c0_41, %c0_42] : memref<1x4x8x128xf32, #tpu.memory_space<vmem>>, vector<1x1x8x128xf32>
      %75 = vector.shape_cast %74 : vector<1x1x8x128xf32> to vector<8x128xf32>
      %76 = vector.shape_cast %73 : vector<8x128xf32> to vector<1x1x8x128xf32>
      tpu.vector_store %arg4[%c0_39, %c2_40, %c0_41, %c0_42], %76 {strides = array<i32>} : memref<1x4x8x128xf32, #tpu.memory_space<vmem>>, vector<1x1x8x128xf32>,
      %c0_43 = arith.constant 0 : index
      %c3 = arith.constant 3 : index
      %c0_44 = arith.constant 0 : index
      %c0_45 = arith.constant 0 : index
      %77 = vector.load %arg4[%c0_43, %c3, %c0_44, %c0_45] : memref<1x4x8x128xf32, #tpu.memory_space<vmem>>, vector<1x1x8x128xf32>
      %78 = vector.shape_cast %77 : vector<1x1x8x128xf32> to vector<8x128xf32>
      %79 = arith.addf %78, %58 : vector<8x128xf32>
      %c0_46 = arith.constant 0 : index
      %c3_47 = arith.constant 3 : index
      %c0_48 = arith.constant 0 : index
      %c0_49 = arith.constant 0 : index
      %80 = vector.load %arg4[%c0_46, %c3_47, %c0_48, %c0_49] : memref<1x4x8x128xf32, #tpu.memory_space<vmem>>, vector<1x1x8x128xf32>
      %81 = vector.shape_cast %80 : vector<1x1x8x128xf32> to vector<8x128xf32>
      %82 = vector.shape_cast %79 : vector<8x128xf32> to vector<1x1x8x128xf32>
      tpu.vector_store %arg4[%c0_46, %c3_47, %c0_48, %c0_49], %82 {strides = array<i32>} : memref<1x4x8x128xf32, #tpu.memory_space<vmem>>, vector<1x1x8x128xf32>,
    } else {
    }
    return
  }
  func.func @transform_0(%arg0: i32, %arg1: i32) -> (i32, i32) {
    %c1_i32 = arith.constant 1 : i32
    %0 = arith.muli %arg0, %c1_i32 : i32
    %1 = arith.addi %0, %arg1 : i32
    %c0_i32 = arith.constant 0 : i32
    %2 = arith.minsi %1, %c0_i32 : i32
    %c0_i32_0 = arith.constant 0 : i32
    %c0_i32_1 = arith.constant 0 : i32
    return %2, %c0_i32_0 : i32, i32
  }
  func.func @transform_1(%arg0: i32, %arg1: i32) -> (i32, i32) {
    %c1_i32 = arith.constant 1 : i32
    %0 = arith.muli %arg0, %c1_i32 : i32
    %1 = arith.addi %0, %arg1 : i32
    %c0_i32 = arith.constant 0 : i32
    %2 = arith.minsi %1, %c0_i32 : i32
    %c0_i32_0 = arith.constant 0 : i32
    %c0_i32_1 = arith.constant 0 : i32
    return %2, %c0_i32_0 : i32, i32
  }
  func.func @transform_2(%arg0: i32, %arg1: i32) -> (i32, i32, i32, i32) {
    %c0_i32 = arith.constant 0 : i32
    %c0_i32_0 = arith.constant 0 : i32
    %c0_i32_1 = arith.constant 0 : i32
    %c0_i32_2 = arith.constant 0 : i32
    return %arg0, %c0_i32, %c0_i32_0, %c0_i32_1 : i32, i32, i32, i32
  }
}

</mosaic_0001>

<bundles_post_ra>
// kernel: tpu_custom_call.1
= control target key start
LH: loop header
LB: loop body
LE: loop exit
PB: predicated region body
PF: predicated region fallthrough
CT: control target
= control target key end

     0   :  { %7 = vsyncpa [#allocation3], 0  ;;  %s371_s0 = inlined_call_operand.hbm [shape: f32[16,128], index: 0, kind: input, shape index: {}]   ;;  %s372_s1 = inlined_call_operand.hbm [shape: f32[16,128], index: 1, kind: input, shape index: {}]   ;;  %s373_s2 = inlined_call_operand.hbm [shape: f32[1,4,8,128], index: 2, kind: output, shape index: {}]  }
   0x1   :  { %8 = vsyncpa [#allocation6], 0 }
   0x2   :  { %9 = vsyncpa [#allocation4], 0  ;;  %s306_s9 = smov [#allocation2]   ;;  %s234_s13 = scalar_lea.hbm %s371_s0, 256 }
   0x3   :  { %s21_s10 = sshll.u32 %s306_s9, 4  ;;  %p235_p0 = scmp.ne.s32.totalorder %s371_s0, %s234_s13  ;;  %s22_s10 = int_to_ptr.vmem [resolvable:$true] %s21_s10 }
   0x4   :  { %p238_p1 = scmp.lt.u32.totalorder %s234_s13, %s371_s0 }
   0x6   :  { %p240_p2 = pnand %p238_p1, %p235_p0 }
   0x8   :  { %243 = shalt.err (!%p240_p2)
}
   0x9   :  { %s244_s18 = scalar_lea.vmem %s22_s10, 256  ;;  %p249_p4 = scmp.lt.s32.totalorder %s22_s10, %s22_s10 }
   0xa   :  { %p245_p3 = scmp.ne.s32.totalorder %s22_s10, %s244_s18  ;;  %p250_p5 = scmp.lt.s32.totalorder %s244_s18, %s244_s18 }
   0xc   :  { %p251_p6 = por %p250_p5, %p249_p4 }
   0xe   :  { %p252_p7 = pnand %p251_p6, %p245_p3 }
  0x10   :  { %255 = shalt.err (!%p252_p7)
}
  0x11   :  { %s307_s19 = smov 128   ;;  %s308_s20 = smov 8  }
  0x12   :  { %27 = dma.hbm_to_vmem [thread:$0]  %s371_s0, 256, %s22_s10, [#allocation3], %s307_s19, %s307_s19, %s308_s20  }
  0x13   :  { %s309_s23 = smov [#allocation5]   ;;  %s256_s27 = scalar_lea.hbm %s372_s1, 256 }
  0x14   :  { %s39_s24 = sshll.u32 %s309_s23, 4  ;;  %p257_p8 = scmp.ne.s32.totalorder %s372_s1, %s256_s27  ;;  %s40_s24 = int_to_ptr.vmem [resolvable:$true] %s39_s24 }
  0x15   :  { %p260_p9 = scmp.lt.u32.totalorder %s256_s27, %s372_s1 }
  0x17   :  { %p262_p10 = pnand %p260_p9, %p257_p8 }
  0x19   :  { %265 = shalt.err (!%p262_p10)
}
  0x1a   :  { %s266_s4 = scalar_lea.vmem %s40_s24, 256  ;;  %p271_p12 = scmp.lt.s32.totalorder %s40_s24, %s40_s24 }
  0x1b   :  { %p267_p11 = scmp.ne.s32.totalorder %s40_s24, %s266_s4  ;;  %p272_p13 = scmp.lt.s32.totalorder %s266_s4, %s266_s4 }
  0x1d   :  { %p273_p0 = por %p272_p13, %p271_p12 }
  0x1f   :  { %p274_p1 = pnand %p273_p0, %p267_p11 }
  0x21   :  { %277 = shalt.err (!%p274_p1)
}
  0x22   :  { %45 = dma.hbm_to_vmem [thread:$0]  %s372_s1, 256, %s40_s24, [#allocation6], %s307_s19, %s307_s19, %s308_s20  }
  0x23   :  { %300 = dma.done.wait [#allocation3], 256  }
  0x24   :  { %301 = vsyncadd [#allocation3], 4294967040 }
  0x25   :  { %302 = dma.done.wait [#allocation6], 256  }
  0x26   :  { %303 = vsyncadd [#allocation6], 4294967040  ;;  %v75_v0 = vld [vmem:[#allocation2] sm:$0xff]  ;;  %v76_v1 = vld [vmem:[#allocation2 + $0x8] sm:$0xff]  ;;  %s310_s1 = smov [#allocation7]  }
  0x27   :  { %v79_v2 = vmul.f32 0.5, %v75_v0  ;;  %v80_v3 = vmul.f32 0.5, %v76_v1  ;;  %v77_v4 = vld [vmem:[#allocation5] sm:$0xff]  ;;  %v78_v5 = vld [vmem:[#allocation5 + $0x8] sm:$0xff]  ;;  %v91_v22 = vmax.f32 %v75_v0, 0.0  ;;  %v92_v24 = vmax.f32 %v76_v1, 0.0 }
  0x28   :  { %v104_v6 = vadd.f32 %v78_v5, %v77_v4  ;;  %v93_v21 = vmul.f32 %v77_v4, %v75_v0  ;;  %v94_v23 = vmul.f32 %v78_v5, %v76_v1  ;;  %s203_s6 = sshll.u32 %s310_s1, 4  ;;  %s204_s6 = int_to_ptr.vmem [resolvable:$true] %s203_s6 }
  0x29   :  { %226 = vtanh.f32 %v79_v2  ;;  %s278_s7 = scalar_lea.vmem %s204_s6, 512  ;;  %p283_p3 = scmp.lt.s32.totalorder %s204_s6, %s204_s6 }
  0x2a   :  { %228 = vtanh.f32 %v80_v3  ;;  %119 = vst [vmem:[#allocation7 + $0x8] sm:$0xff] %v104_v6  ;;  %v95_v25 = vsub.f32 %v91_v22, %v93_v21  ;;  %v96_v27 = vsub.f32 %v92_v24, %v94_v23  ;;  %p279_p2 = scmp.ne.s32.totalorder %s204_s6, %s278_s7  ;;  %p284_p4 = scmp.lt.s32.totalorder %s278_s7, %s278_s7 }
  0x2c   :  { %p285_p5 = por %p284_p4, %p283_p3 }
  0x2e   :  { %p286_p6 = pnand %p285_p5, %p279_p2 }
  0x33   :  { %v227_v7 = vpop.eup %226 }
  0x34   :  { %v229_v8 = vpop.eup %228  ;;  %v83_v9 = vmul.f32 0.5, %v227_v7 }
  0x35   :  { %v84_v10 = vmul.f32 0.5, %v229_v8 }
  0x36   :  { %v85_v11 = vadd.f32 0.5, %v83_v9 }
  0x37   :  { %v86_v12 = vadd.f32 0.5, %v84_v10 }
  0x38   :  { %v105_v13 = vmul.f32 %v85_v11, %v77_v4  ;;  %v87_v14 = vsub.f32 1.0, %v85_v11 }
  0x39   :  { %v103_v15 = vadd.f32 %v86_v12, %v85_v11  ;;  %v106_v16 = vmul.f32 %v86_v12, %v78_v5  ;;  %v88_v17 = vsub.f32 1.0, %v86_v12 }
  0x3a   :  { %v89_v18 = vmax.f32 %v85_v11, %v87_v14 }
  0x3b   :  { %v107_v19 = vadd.f32 %v106_v16, %v105_v13  ;;  %v90_v20 = vmax.f32 %v86_v12, %v88_v17  ;;  %115 = vst [vmem:[#allocation7] sm:$0xff] %v103_v15 }
  0x3c   :  { %230 = vlog2.f32 %v89_v18 }
  0x3d   :  { %232 = vlog2.f32 %v90_v20  ;;  %123 = vst [vmem:[#allocation7 + $0x10] sm:$0xff] %v107_v19 }
  0x46   :  { %v231_v26 = vpop.eup %230 }
  0x47   :  { %v233_v28 = vpop.eup %232  ;;  %v98_v29 = vmul.f32 0.6931472, %v231_v26 }
  0x48   :  { %v100_v30 = vmul.f32 0.6931472, %v233_v28 }
  0x49   :  { %v101_v31 = vsub.f32 %v95_v25, %v98_v29 }
  0x4a   :  { %v102_v32 = vsub.f32 %v96_v27, %v100_v30 }
  0x4c   :  { %v108_v33 = vadd.f32 %v102_v32, %v101_v31 }
  0x4e   :  { %127 = vst [vmem:[#allocation7 + $0x18] sm:$0xff] %v108_v33 }
  0x4f   :  { %289 = shalt.err (!%p286_p6)
}
  0x50   :  { %s290_s10 = scalar_lea.hbm %s373_s2, 512 }
  0x51   :  { %p291_p7 = scmp.ne.s32.totalorder %s373_s2, %s290_s10  ;;  %p294_p8 = scmp.lt.u32.totalorder %s290_s10, %s373_s2 }
  0x53   :  { %p296_p9 = pnand %p294_p8, %p291_p7 }
  0x55   :  { %299 = shalt.err (!%p296_p9)
}
  0x56   :  { %209 = dma.vmem_to_hbm [thread:$0]  %s204_s6, 512, %s373_s2, [#allocation4], %s307_s19, %s307_s19, %s308_s20  }
  0x57   :  { %304 = dma.done.wait [#allocation4], 512  }
  0x58   :  { %305 = vsyncadd [#allocation4], 4294966784 }
  0x59   :  { %213 = vsyncpa [#allocation3], 1 }
  0x5a   :  { %214 = vsyncpa [#allocation6], 1 }
  0x5b   :  { %215 = vsyncpa [#allocation4], 1 }

</bundles_post_ra>
